<compile_context>
chip_gen: v6e
topology: v6e:2x2x1
jax: 0.10.0
libtpu: 0.0.40
codegen_flags: <defaults>
</compile_context>

<pallas_src>
import jax
import jax.numpy as jnp
from jax.experimental import pallas as pl
from jax.experimental.pallas import tpu as pltpu


def _round_up(x, m):
    return ((x + m - 1) // m) * m


# ------------------------- call 1: projection  hw = h @ W -------------------------
def _project_kernel(h_ref, w_ref, hw_ref):
    hw_ref[...] = jnp.dot(
        h_ref[...], w_ref[...], preferred_element_type=jnp.float32
    ).astype(hw_ref.dtype)


# --------------------- call 2: aggregation  out = relu(adj @ hw) -------------------
def _aggregate_kernel(adj_ref, hw_ref, o_ref, acc_ref):
    k = pl.program_id(1)

    @pl.when(k == 0)
    def _init():
        acc_ref[...] = jnp.zeros_like(acc_ref)

    acc_ref[...] += jnp.dot(
        adj_ref[...], hw_ref[...], preferred_element_type=jnp.float32
    )

    @pl.when(k == pl.num_programs(1) - 1)
    def _finalize():
        o_ref[...] = jnp.maximum(acc_ref[...], 0.0).astype(o_ref.dtype)


def graph_convolution(h, adj, weight, *, tm=256, tk=512, matmul_dtype=None):
    """relu(adj @ (h @ weight)) as two Pallas TPU kernels.

    tm: row tile of adj / output (M axis).
    tk: contraction tile (columns of adj / rows of hw).
    matmul_dtype: optional dtype (e.g. jnp.bfloat16) for the MXU operands;
                  accumulation + relu stay f32 and the output keeps h's dtype.
    """
    N, f_in = h.shape
    f_in_w, f_out = weight.shape
    assert adj.shape == (N, N)
    assert f_in_w == f_in
    out_dtype = h.dtype

    if matmul_dtype is not None:
        h = h.astype(matmul_dtype)
        adj = adj.astype(matmul_dtype)
        weight = weight.astype(matmul_dtype)
    op_dtype = h.dtype

    # Clamp tiles for small graphs; keep sublane dims 8-aligned and the
    # contraction (lane) tile of adj 128-aligned.
    tm = max(8, min(tm, _round_up(N, 8)))
    tk = max(128, min(tk, _round_up(N, 128)))

    n_m = _round_up(N, tm)   # padded output / adj rows
    n_k = _round_up(N, tk)   # padded contraction extent (adj cols / hw rows)

    h_p = h if n_k == N else jnp.pad(h, ((0, n_k - N), (0, 0)))
    adj_p = adj
    if n_m != N or n_k != N:
        adj_p = jnp.pad(adj, ((0, n_m - N), (0, n_k - N)))

    # ---- projection: hw = h @ W (computed once, tiled over rows of h) ----
    hw = pl.pallas_call(
        _project_kernel,
        out_shape=jax.ShapeDtypeStruct((n_k, f_out), op_dtype),
        grid_spec=pltpu.PrefetchScalarGridSpec(
            num_scalar_prefetch=0,
            grid=(n_k // tk,),
            in_specs=[
                pl.BlockSpec((tk, f_in), lambda i: (i, 0)),      # h row tile
                pl.BlockSpec((f_in, f_out), lambda i: (0, 0)),   # W (tiny, resident)
            ],
            out_specs=pl.BlockSpec((tk, f_out), lambda i: (i, 0)),
        ),
        compiler_params=pltpu.CompilerParams(
            dimension_semantics=("parallel",),
            vmem_limit_bytes=64 * 1024 * 1024,
        ),
    )(h_p, weight)

    # ---- aggregation: out = relu(adj @ hw), K-tiled with f32 accumulator ----
    out_p = pl.pallas_call(
        _aggregate_kernel,
        out_shape=jax.ShapeDtypeStruct((n_m, f_out), out_dtype),
        grid_spec=pltpu.PrefetchScalarGridSpec(
            num_scalar_prefetch=0,
            grid=(n_m // tm, n_k // tk),
            in_specs=[
                pl.BlockSpec((tm, tk), lambda i, k: (i, k)),      # adj tile
                pl.BlockSpec((tk, f_out), lambda i, k: (k, 0)),   # hw K-tile
            ],
            out_specs=pl.BlockSpec((tm, f_out), lambda i, k: (i, 0)),
            scratch_shapes=[pltpu.VMEM((tm, f_out), jnp.float32)],
        ),
        compiler_params=pltpu.CompilerParams(
            dimension_semantics=("parallel", "arbitrary"),
            vmem_limit_bytes=64 * 1024 * 1024,
        ),
    )(adj_p, hw)

    return out_p if n_m == N else out_p[:N]


def xavier_normal(key, fan_in, fan_out, gain=0.8, dtype=jnp.float32):
    # Matches torch.nn.init.xavier_normal_: std = gain * sqrt(2 / (fan_in + fan_out))
    std = gain * (2.0 / (fan_in + fan_out)) ** 0.5
    return std * jax.random.normal(key, (fan_in, fan_out), dtype=dtype)


def _make_inputs(key, n, f_in, f_out):
    k_h, k_adj, k_w = jax.random.split(key, 3)
    h = jax.random.normal(k_h, (n, f_in), dtype=jnp.float32)
    a = (jax.random.uniform(k_adj, (n, n)) < 0.1).astype(jnp.float32)
    adj = a + jnp.eye(n, dtype=jnp.float32)
    adj = adj / jnp.sum(adj, axis=1, keepdims=True)   # row-normalized adjacency
    w = xavier_normal(k_w, f_in, f_out, gain=0.8)
    return h, adj, w


if __name__ == "__main__":
    key0, key1 = jax.random.split(jax.random.PRNGKey(0), 2)

    # Case 1: aligned small graph (N=128, F_in=64, F_out=128), f32 path.
    h, adj, w = _make_inputs(key0, 128, 64, 128)
    out = jax.block_until_ready(graph_convolution(h, adj, w))
    ref = jnp.maximum(adj @ (h @ w), 0.0)
    assert out.shape == ref.shape
    assert jnp.allclose(out, ref, atol=1e-4, rtol=1e-4), "f32 mismatch vs reference"

    # Case 2: same graph, bf16 MXU operands with f32 accumulation (v6e/v7x path).
    out_bf16 = jax.block_until_ready(
        graph_convolution(h, adj, w, matmul_dtype=jnp.bfloat16))
    assert out_bf16.dtype == jnp.float32
    assert jnp.allclose(out_bf16, ref, atol=5e-2, rtol=5e-2), "bf16 mismatch vs reference"

    # Case 3: ragged shape (N=100, F_in=48, F_out=64) exercising the padded grid.
    h2, adj2, w2 = _make_inputs(key1, 100, 48, 64)
    out2 = jax.block_until_ready(graph_convolution(h2, adj2, w2))
    ref2 = jnp.maximum(adj2 @ (h2 @ w2), 0.0)
    assert out2.shape == (100, 64)
    assert jnp.allclose(out2, ref2, atol=1e-4, rtol=1e-4), "padded-case mismatch"

    print("KERNEL_OK")
</pallas_src>

<mosaic_0001>
module attributes {stable_mosaic.version = 11 : i64} {
  func.func @_project_kernel(%arg0: i32, %arg1: memref<128x64xf32, #tpu.memory_space<vmem>>, %arg2: memref<64x128xf32, #tpu.memory_space<vmem>>, %arg3: memref<128x128xf32, #tpu.memory_space<vmem>>) attributes {dimension_semantics = [#tpu.dimension_semantics<parallel>], iteration_bounds = array<i64: 1>, scalar_prefetch = 0 : i64, scratch_operands = 0 : i64, tpu.core_type = #tpu.core_type<tc>, window_params = [{transform_indices = @transform_0, window_bounds = array<i64: 128, 64>}, {pipeline_mode = #tpu.pipeline_mode<synchronous>, transform_indices = @transform_1, window_bounds = array<i64: 64, 128>}, {transform_indices = @transform_2, window_bounds = array<i64: 128, 128>}]} {
    %c0 = arith.constant 0 : index
    %c0_0 = arith.constant 0 : index
    %0 = vector.load %arg1[%c0, %c0_0] : memref<128x64xf32, #tpu.memory_space<vmem>>, vector<128x64xf32>
    %c0_1 = arith.constant 0 : index
    %c0_2 = arith.constant 0 : index
    %1 = vector.load %arg2[%c0_1, %c0_2] : memref<64x128xf32, #tpu.memory_space<vmem>>, vector<64x128xf32>
    %cst = arith.constant dense<0.000000e+00> : vector<128x128xf32>
    %2 = tpu.matmul %0, %1, %cst {dimension_numbers = #tpu.dot_dimension_numbers<[1], [0], [0], [1], [0, 0, 1, 1], [], []>} : vector<128x64xf32>, vector<64x128xf32>, vector<128x128xf32> -> vector<128x128xf32>
    %c0_3 = arith.constant 0 : index
    %c0_4 = arith.constant 0 : index
    %3 = vector.load %arg3[%c0_3, %c0_4] : memref<128x128xf32, #tpu.memory_space<vmem>>, vector<128x128xf32>
    tpu.vector_store %arg3[%c0_3, %c0_4], %2 {strides = array<i32>} : memref<128x128xf32, #tpu.memory_space<vmem>>, vector<128x128xf32>,
    return
  }
  func.func @transform_0(%arg0: i32) -> (i32, i32) {
    %c0_i32 = arith.constant 0 : i32
    %c0_i32_0 = arith.constant 0 : i32
    return %arg0, %c0_i32 : i32, i32
  }
  func.func @transform_1(%arg0: i32) -> (i32, i32) {
    %c0_i32 = arith.constant 0 : i32
    %c0_i32_0 = arith.constant 0 : i32
    %c0_i32_1 = arith.constant 0 : i32
    return %c0_i32, %c0_i32_0 : i32, i32
  }
  func.func @transform_2(%arg0: i32) -> (i32, i32) {
    %c0_i32 = arith.constant 0 : i32
    %c0_i32_0 = arith.constant 0 : i32
    return %arg0, %c0_i32 : i32, i32
  }
}

</mosaic_0001>

<bundles_post_ra>
// kernel: tpu_custom_call.1
= control target key start
LH: loop header
LB: loop body
LE: loop exit
PB: predicated region body
PF: predicated region fallthrough
CT: control target
= control target key end

     0   :  { %s492_s0 = inlined_call_operand.vmem [shape: f32[128,64], index: 0, kind: input, shape index: {}]   ;;  %s493_s1 = inlined_call_operand.vmem [shape: f32[64,128], index: 1, kind: input, shape index: {}]   ;;  %s494_s2 = inlined_call_operand.hbm [shape: f32[128,128], index: 2, kind: output, shape index: {}]  }
   0x1   :  { %v35_v0 = vld [vmem:[%s493_s1 + $0x38] sm:$0xff]  ;;  %v34_v1 = vld [vmem:[%s493_s1 + $0x30] sm:$0xff]  ;;  %v33_v2 = vld [vmem:[%s493_s1 + $0x28] sm:$0xff] }
   0x2   :  { %302 = vmatprep.subr.mxu0 %v35_v0  ;;  %342 = vmatprep.subr.mxu1 %v35_v0  ;;  %v32_v3 = vld [vmem:[%s493_s1 + $0x20] sm:$0xff]  ;;  %v31_v4 = vld [vmem:[%s493_s1 + $0x18] sm:$0xff]  ;;  %v30_v5 = vld [vmem:[%s493_s1 + $0x10] sm:$0xff] }
   0x3   :  { %303 = vmatpush3.msra.mxu0 %v35_v0  ;;  %350 = vmatpush3.msra.mxu1 %v35_v0 }
   0x4   :  { %304 = vmatprep.subr.mxu0 %v34_v1  ;;  %343 = vmatprep.subr.mxu1 %v34_v1 }
   0x5   :  { %305 = vmatpush3.msra.mxu0 %v34_v1  ;;  %351 = vmatpush3.msra.mxu1 %v34_v1 }
   0x6   :  { %306 = vmatprep.subr.mxu0 %v33_v2  ;;  %344 = vmatprep.subr.mxu1 %v33_v2 }
   0x7   :  { %307 = vmatpush3.msra.mxu0 %v33_v2  ;;  %352 = vmatpush3.msra.mxu1 %v33_v2 }
   0x8   :  { %308 = vmatprep.subr.mxu0 %v32_v3  ;;  %345 = vmatprep.subr.mxu1 %v32_v3 }
   0x9   :  { %309 = vmatpush3.msra.mxu0 %v32_v3  ;;  %353 = vmatpush3.msra.mxu1 %v32_v3 }
   0xa   :  { %7 = vsyncpa [#allocation3], 0  ;;  %310 = vmatprep.subr.mxu0 %v31_v4  ;;  %346 = vmatprep.subr.mxu1 %v31_v4  ;;  %v29_v6 = vld [vmem:[%s493_s1 + $0x8] sm:$0xff]  ;;  %v28_v7 = vld [vmem:[%s493_s1] sm:$0xff]  ;;  %vm36_vm0 = vcmask 523264  }
   0xb   :  { %311 = vmatpush3.msra.mxu0 %v31_v4  ;;  %354 = vmatpush3.msra.mxu1 %v31_v4  ;;  %v12_v8 = vld [vmem:[%s492_s0] sm:$0xff]  ;;  %v13_v10 = vld [vmem:[%s492_s0 + $0x8] sm:$0xff]  ;;  %v14_v12 = vld [vmem:[%s492_s0 + $0x10] sm:$0xff] }
   0xc   :  { %312 = vmatprep.subr.mxu0 %v30_v5  ;;  %347 = vmatprep.subr.mxu1 %v30_v5  ;;  %v20_v9 = vld [vmem:[%s492_s0 + $0x40] sm:$0xff]  ;;  %v21_v11 = vld [vmem:[%s492_s0 + $0x48] sm:$0xff]  ;;  %v22_v13 = vld [vmem:[%s492_s0 + $0x50] sm:$0xff] }
   0xd   :  { %313 = vmatpush3.msra.mxu0 %v30_v5  ;;  %355 = vmatpush3.msra.mxu1 %v30_v5  ;;  %v15_v14 = vld [vmem:[%s492_s0 + $0x18] sm:$0xff]  ;;  %v16_v16 = vld [vmem:[%s492_s0 + $0x20] sm:$0xff]  ;;  %v17_v18 = vld [vmem:[%s492_s0 + $0x28] sm:$0xff] }
   0xe   :  { %314 = vmatprep.subr.mxu0 %v29_v6  ;;  %348 = vmatprep.subr.mxu1 %v29_v6  ;;  %v23_v15 = vld [vmem:[%s492_s0 + $0x58] sm:$0xff]  ;;  %v24_v17 = vld [vmem:[%s492_s0 + $0x60] sm:$0xff]  ;;  %v25_v19 = vld [vmem:[%s492_s0 + $0x68] sm:$0xff] }
   0xf   :  { %315 = vmatpush3.msra.mxu0 %v29_v6  ;;  %356 = vmatpush3.msra.mxu1 %v29_v6  ;;  %v18_v20 = vld [vmem:[%s492_s0 + $0x30] sm:$0xff]  ;;  %v19_v22 = vld [vmem:[%s492_s0 + $0x38] sm:$0xff] }
  0x10   :  { %316 = vmatprep.subr.mxu0 %v28_v7  ;;  %349 = vmatprep.subr.mxu1 %v28_v7  ;;  %v26_v21 = vld [vmem:[%s492_s0 + $0x70] sm:$0xff]  ;;  %v27_v23 = vld [vmem:[%s492_s0 + $0x78] sm:$0xff]  ;;  %s383_s0 = smov [#allocation2]  }
  0x11   :  { %317 = vmatpush3.msra.mxu0 %v28_v7  ;;  %357 = vmatpush3.msra.mxu1 %v28_v7  ;;  %s251_s28 = sshll.u32 %s383_s0, 4  ;;  %s252_s28 = int_to_ptr.vmem [resolvable:$true] %s251_s28 }
  0x12   :  { %318 = vmatprep.mubr.msk.f32.mxu0 %vm36_vm0, %v12_v8  ;;  %330 = vmatprep.mubr.msk.f32.mxu1 %vm36_vm0, %v20_v9  ;;  %s361_s29 = scalar_lea.vmem %s252_s28, 2048  ;;  %p366_p1 = scmp.lt.s32.totalorder %s252_s28, %s252_s28 }
  0x13   :  { %319 = vmatmul.mubr.msk.f32.vlgmr.msra.gmra.mxu0 %vm36_vm0, %v13_v10  ;;  %331 = vmatmul.mubr.msk.f32.vlgmr.msra.gmra.mxu1 %vm36_vm0, %v21_v11  ;;  %p362_p0 = scmp.ne.s32.totalorder %s252_s28, %s361_s29  ;;  %p367_p2 = scmp.lt.s32.totalorder %s361_s29, %s361_s29 }
  0x14   :  { %321 = vmatprep.mubr.msk.f32.mxu0 %vm36_vm0, %v14_v12  ;;  %333 = vmatprep.mubr.msk.f32.mxu1 %vm36_vm0, %v22_v13 }
  0x15   :  { %p368_p3 = por %p367_p2, %p366_p1 }
  0x17   :  { %322 = vmatmul.mubr.msk.f32.gmra.mxu0 %vm36_vm0, %v15_v14  ;;  %334 = vmatmul.mubr.msk.f32.gmra.mxu1 %vm36_vm0, %v23_v15  ;;  %p369_p4 = pnand %p368_p3, %p362_p0 }
  0x18   :  { %324 = vmatprep.mubr.msk.f32.mxu0 %vm36_vm0, %v16_v16  ;;  %336 = vmatprep.mubr.msk.f32.mxu1 %vm36_vm0, %v24_v17 }
  0x1b   :  { %325 = vmatmul.mubr.msk.f32.gmra.mxu0 %vm36_vm0, %v17_v18  ;;  %337 = vmatmul.mubr.msk.f32.gmra.mxu1 %vm36_vm0, %v25_v19 }
  0x1c   :  { %327 = vmatprep.mubr.msk.f32.mxu0 %vm36_vm0, %v18_v20  ;;  %339 = vmatprep.mubr.msk.f32.mxu1 %vm36_vm0, %v26_v21 }
  0x1f   :  { %328 = vmatmul.mubr.msk.f32.gmra.mxu0 %vm36_vm0, %v19_v22  ;;  %340 = vmatmul.mubr.msk.f32.gmra.mxu1 %vm36_vm0, %v27_v23 }
  0xd3   :  { %v320_v24 = vpop.f32.mrf.mxu0  ;;  %v332_v25 = vpop.f32.mrf.mxu1 }
  0xd4   :  { %231 = vst [vmem:[#allocation2 + $0x8] sm:$0xff] %v320_v24  ;;  %239 = vst [vmem:[#allocation2 + $0x48] sm:$0xff] %v332_v25 }
  0xd5   :  { %v151_v26 = vpop.f32.mrf.mxu0  ;;  %v191_v27 = vpop.f32.mrf.mxu1 }
  0xd6   :  { %230 = vst [vmem:[#allocation2] sm:$0xff] %v151_v26  ;;  %238 = vst [vmem:[#allocation2 + $0x40] sm:$0xff] %v191_v27 }
  0xd7   :  { %v323_v28 = vpop.f32.mrf.mxu0  ;;  %v335_v29 = vpop.f32.mrf.mxu1 }
  0xd8   :  { %233 = vst [vmem:[#allocation2 + $0x18] sm:$0xff] %v323_v28  ;;  %241 = vst [vmem:[#allocation2 + $0x58] sm:$0xff] %v335_v29 }
  0xd9   :  { %v161_v30 = vpop.f32.mrf.mxu0  ;;  %v201_v31 = vpop.f32.mrf.mxu1 }
  0xda   :  { %232 = vst [vmem:[#allocation2 + $0x10] sm:$0xff] %v161_v30  ;;  %240 = vst [vmem:[#allocation2 + $0x50] sm:$0xff] %v201_v31 }
  0xdb   :  { %v326_v32 = vpop.f32.mrf.mxu0  ;;  %v338_v33 = vpop.f32.mrf.mxu1 }
  0xdc   :  { %235 = vst [vmem:[#allocation2 + $0x28] sm:$0xff] %v326_v32  ;;  %243 = vst [vmem:[#allocation2 + $0x68] sm:$0xff] %v338_v33 }
  0xdd   :  { %v171_v34 = vpop.f32.mrf.mxu0  ;;  %v211_v35 = vpop.f32.mrf.mxu1 }
  0xde   :  { %234 = vst [vmem:[#allocation2 + $0x20] sm:$0xff] %v171_v34  ;;  %242 = vst [vmem:[#allocation2 + $0x60] sm:$0xff] %v211_v35 }
  0xdf   :  { %v329_v36 = vpop.f32.mrf.mxu0  ;;  %v341_v37 = vpop.f32.mrf.mxu1 }
  0xe0   :  { %237 = vst [vmem:[#allocation2 + $0x38] sm:$0xff] %v329_v36  ;;  %245 = vst [vmem:[#allocation2 + $0x78] sm:$0xff] %v341_v37 }
  0xe1   :  { %v181_v38 = vpop.f32.mrf.mxu0  ;;  %v221_v39 = vpop.f32.mrf.mxu1 }
  0xe2   :  { %236 = vst [vmem:[#allocation2 + $0x30] sm:$0xff] %v181_v38  ;;  %244 = vst [vmem:[#allocation2 + $0x70] sm:$0xff] %v221_v39 }
  0xe3   :  { %372 = shalt.err (!%p369_p4)
}
  0xe4   :  { %s384_s30 = smov 128   ;;  %s385_s1 = smov 8  }
  0xe5   :  { %257 = dma.vmem_to_hbm [thread:$0]  %s252_s28, 2048, %s494_s2, [#allocation3], %s384_s30, %s384_s30, %s385_s1  }
  0xe6   :  { %381 = dma.done.wait [#allocation3], 2048  }
  0xe7   :  { %382 = vsyncadd [#allocation3], 4294965248 }
  0xe8   :  { %261 = vsyncpa [#allocation3], 1 }

</bundles_post_ra>
